<compile_context>
chip_gen: v7x
topology: tpu7x:2x2x1
jax: 0.10.0
libtpu: 0.0.40
codegen_flags: <defaults>
</compile_context>

<pallas_src>
import math
import functools

import jax
import jax.numpy as jnp
from jax.experimental import pallas as pl
from jax.experimental.pallas import tpu as pltpu


_MASK_VALUE = -1e30  # large finite negative (avoids -inf - -inf = NaN corners)

# Contract the LAST dim of both operands (i.e. "x @ w.T" / "q @ k.T") without a
# materialized transpose — the MXU consumes the transposed operand directly.
_TRANS_B_DIMS = (((1,), (1,)), ((), ()))


def _largest_divisor_tile(dim, pref):
    """Largest tile <= pref that evenly divides dim (keeps grids exact)."""
    t = min(pref, dim)
    while dim % t:
        t -= 1
    return t


# ----------------------------------------------------------------------------
# Tiled linear:  y = x @ w.T   with x:(M,K), w:(N,K)  (nn.Linear, bias=False)
# ----------------------------------------------------------------------------
def _matmul_kernel(x_ref, w_ref, o_ref, acc_ref):
    # x_ref: (tm, tk) bf16   w_ref: (tn, tk) bf16   o_ref: (tm, tn)
    @pl.when(pl.program_id(2) == 0)
    def _init():
        acc_ref[...] = jnp.zeros_like(acc_ref)

    acc_ref[...] += jax.lax.dot_general(
        x_ref[...], w_ref[...],
        dimension_numbers=_TRANS_B_DIMS,
        preferred_element_type=jnp.float32,
    )

    @pl.when(pl.program_id(2) == pl.num_programs(2) - 1)
    def _store():
        o_ref[...] = acc_ref[...].astype(o_ref.dtype)


def linear(x, w, *, out_dtype=jnp.float32, tm=256, tn=256, tk=256):
    """y = x @ w.T ; x:(M,K), w:(N,K) (PyTorch layout). bf16 MXU, f32 acc.

    Tile prefs: ~512 on v6e (128 MiB VMEM), 256 on v7x (64 MiB), 128-256 on v5e.
    """
    M, K = x.shape
    N, K2 = w.shape
    assert K == K2
    tm = _largest_divisor_tile(M, tm)
    tn = _largest_divisor_tile(N, tn)
    tk = _largest_divisor_tile(K, tk)

    return pl.pallas_call(
        _matmul_kernel,
        out_shape=jax.ShapeDtypeStruct((M, N), out_dtype),
        grid_spec=pltpu.PrefetchScalarGridSpec(
            num_scalar_prefetch=0,
            grid=(M // tm, N // tn, K // tk),
            in_specs=[
                pl.BlockSpec((tm, tk), lambda i, j, k: (i, k)),
                pl.BlockSpec((tn, tk), lambda i, j, k: (j, k)),
            ],
            out_specs=pl.BlockSpec((tm, tn), lambda i, j, k: (i, j)),
            scratch_shapes=[pltpu.VMEM((tm, tn), jnp.float32)],
        ),
        compiler_params=pltpu.CompilerParams(
            dimension_semantics=("parallel", "parallel", "arbitrary")),
    )(x.astype(jnp.bfloat16), w.astype(jnp.bfloat16))


# ----------------------------------------------------------------------------
# Flash-style causal attention, GQA + per-head slicing handled via index_map.
# q:(B,S,H*D), k/v:(B,S,Hkv*D)  ->  out:(B,S,H*D)   (no transposes anywhere)
# ----------------------------------------------------------------------------
def _flash_attn_kernel(q_ref, k_ref, v_ref, o_ref, m_sc, l_sc, acc_sc, *, tq, tk):
    # blocks: q (1,tq,D) bf16, k/v (1,tk,D) bf16, o (1,tq,D) bf16
    qi = pl.program_id(2)
    ki = pl.program_id(3)

    @pl.when(ki == 0)
    def _init():
        m_sc[...] = jnp.full_like(m_sc, _MASK_VALUE)
        l_sc[...] = jnp.zeros_like(l_sc)
        acc_sc[...] = jnp.zeros_like(acc_sc)

    q_start = qi * tq
    k_start = ki * tk

    # Causal tile pruning: KV tiles strictly above the diagonal contribute
    # nothing — skip their QK / softmax / PV work entirely (~2x MXU+VPU).
    @pl.when(k_start <= q_start + (tq - 1))
    def _compute():
        # scores (softmax scale was pre-folded into q via the RoPE tables)
        s = jax.lax.dot_general(
            q_ref[0], k_ref[0], dimension_numbers=_TRANS_B_DIMS,
            preferred_element_type=jnp.float32)                  # (tq, tk) f32

        # Per-tile causal mask from iota + tile offsets (no (S,S) tensors).
        row = q_start + jax.lax.broadcasted_iota(jnp.int32, (tq, tk), 0)
        col = k_start + jax.lax.broadcasted_iota(jnp.int32, (tq, tk), 1)
        s = jnp.where(col <= row, s, _MASK_VALUE)

        m_prev = m_sc[...]                                       # (tq, 1)
        m_new = jnp.maximum(m_prev, jnp.max(s, axis=-1, keepdims=True))
        alpha = jnp.exp(m_prev - m_new)
        p = jnp.exp(s - m_new)                                   # (tq, tk)
        l_sc[...] = alpha * l_sc[...] + jnp.sum(p, axis=-1, keepdims=True)
        acc_sc[...] = alpha * acc_sc[...] + jnp.dot(
            p.astype(v_ref.dtype), v_ref[0],
            preferred_element_type=jnp.float32)                  # (tq, D)
        m_sc[...] = m_new

    @pl.when(ki == pl.num_programs(3) - 1)
    def _finalize():
        # Deferred 1/l normalization on the (tq,D) accumulator only; EUP recip.
        o_ref[0] = (acc_sc[...] *
                    pl.reciprocal(l_sc[...], approx=True)).astype(o_ref.dtype)


def sdpa_causal_gqa(q, k, v, *, num_heads, tq=128, tk=128):
    """q:(B,S,H*D), k/v:(B,S,Hkv*D) -> (B,S,H*D) bf16. Causal attention.

    GQA + per-head tile selection both happen in the index_maps: query head h
    reads columns [h*D:(h+1)*D] of q and KV head h // (H // Hkv) of k/v, and
    writes columns [h*D:(h+1)*D] of the output. No repeats, no transposes.
    """
    B, S, E = q.shape
    H = num_heads
    D = E // H
    Ekv = k.shape[-1]
    Hkv = Ekv // D
    assert H % Hkv == 0
    r = H // Hkv
    tq = _largest_divisor_tile(S, tq)
    tk = _largest_divisor_tile(S, tk)

    kernel = functools.partial(_flash_attn_kernel, tq=tq, tk=tk)

    q_spec = pl.BlockSpec((1, tq, D), lambda b, h, i, j: (b, i, h))
    kv_spec = pl.BlockSpec((1, tk, D), lambda b, h, i, j: (b, j, h // r))
    o_spec = pl.BlockSpec((1, tq, D), lambda b, h, i, j: (b, i, h))

    return pl.pallas_call(
        kernel,
        out_shape=jax.ShapeDtypeStruct((B, S, E), jnp.bfloat16),
        grid_spec=pltpu.PrefetchScalarGridSpec(
            num_scalar_prefetch=0,
            grid=(B, H, S // tq, S // tk),
            in_specs=[q_spec, kv_spec, kv_spec],
            out_specs=o_spec,
            scratch_shapes=[
                pltpu.VMEM((tq, 1), jnp.float32),   # running max
                pltpu.VMEM((tq, 1), jnp.float32),   # running denom
                pltpu.VMEM((tq, D), jnp.float32),   # output accumulator
            ],
        ),
        compiler_params=pltpu.CompilerParams(
            dimension_semantics=("parallel", "parallel", "parallel", "arbitrary")),
    )(q.astype(jnp.bfloat16), k.astype(jnp.bfloat16), v.astype(jnp.bfloat16))


# ----------------------------------------------------------------------------
# RoPE (torchtune RotaryPositionalEmbeddings: interleaved pairs), on (B,S,H,D).
# `scale` lets the caller fold the softmax 1/sqrt(D) into the q tables (RoPE is
# linear in cos/sin), so the attention kernel does no per-tile scaling.
# ----------------------------------------------------------------------------
def rope_bshd(x, base, *, scale=1.0):
    B, S, H, D = x.shape
    half = D // 2
    theta = 1.0 / (base ** (jnp.arange(0, D, 2, dtype=jnp.float32) / D))  # (half,)
    pos = jnp.arange(S, dtype=jnp.float32)
    idx = pos[:, None] * theta[None, :]                                    # (S, half)
    cos = (jnp.cos(idx) * scale)[None, :, None, :]                         # (1,S,1,half)
    sin = (jnp.sin(idx) * scale)[None, :, None, :]
    xr = x.astype(jnp.float32).reshape(B, S, H, half, 2)
    x0, x1 = xr[..., 0], xr[..., 1]
    out = jnp.stack([x0 * cos - x1 * sin, x1 * cos + x0 * sin], axis=-1)
    return out.reshape(B, S, H, D)


# ----------------------------------------------------------------------------
# CasualSelfAttention2 forward (kv_cache=None, mask=None, attn_dropout=0.0)
# ----------------------------------------------------------------------------
def casual_self_attention2(x, params, *, num_heads, num_kv_heads, rope_base):
    B, S, E = x.shape
    D = E // num_heads
    Ekv = num_kv_heads * D
    scale = 1.0 / math.sqrt(D)
    x2 = x.reshape(B * S, E)

    # Projections (bf16 out, f32 accumulation). Kept in (B, S, heads*D) layout.
    q = linear(x2, params["wq"], out_dtype=jnp.bfloat16).reshape(B, S, num_heads, D)
    k = linear(x2, params["wk"], out_dtype=jnp.bfloat16).reshape(B, S, num_kv_heads, D)
    v = linear(x2, params["wv"], out_dtype=jnp.bfloat16).reshape(B, S, Ekv)

    # RoPE is per-position/per-pair, so applying it to the Hkv kv-heads is
    # identical to applying it after a GQA repeat (which is never materialized).
    # Softmax scale is folded into the q tables.
    q = rope_bshd(q, rope_base, scale=scale).astype(jnp.bfloat16).reshape(B, S, E)
    k = rope_bshd(k, rope_base).astype(jnp.bfloat16).reshape(B, S, Ekv)

    out = sdpa_causal_gqa(q, k, v, num_heads=num_heads)     # (B, S, E) bf16
    return linear(out.reshape(B * S, E), params["wo"],
                  out_dtype=jnp.float32).reshape(B, S, E)


# ----------------------------------------------------------------------------
# Pure-JAX reference (for a loose numerical sanity check against bf16 kernels)
# ----------------------------------------------------------------------------
def _ref_forward(x, params, *, num_heads, num_kv_heads, rope_base):
    B, S, E = x.shape
    D = E // num_heads
    q = (x @ params["wq"].T).reshape(B, S, num_heads, D)
    k = (x @ params["wk"].T).reshape(B, S, num_kv_heads, D)
    v = (x @ params["wv"].T).reshape(B, S, num_kv_heads, D)
    q = rope_bshd(q, rope_base).transpose(0, 2, 1, 3)
    k = rope_bshd(k, rope_base).transpose(0, 2, 1, 3)
    v = v.transpose(0, 2, 1, 3)
    r = num_heads // num_kv_heads
    k = jnp.repeat(k, r, axis=1)
    v = jnp.repeat(v, r, axis=1)
    s = jnp.einsum("bhqd,bhkd->bhqk", q, k) / math.sqrt(D)
    causal = jnp.tril(jnp.ones((S, S), dtype=bool))
    s = jnp.where(causal[None, None], s, -jnp.inf)
    p = jax.nn.softmax(s, axis=-1)
    o = jnp.einsum("bhqk,bhkd->bhqd", p, v)
    o = o.transpose(0, 2, 1, 3).reshape(B, S, E)
    return o @ params["wo"].T


# ----------------------------------------------------------------------------
# Deterministic parameter init + run
# ----------------------------------------------------------------------------
def init_params(key, embed_dim, num_heads, num_kv_heads):
    head_dim = embed_dim // num_heads
    kq, kk, kv, ko = jax.random.split(key, 4)
    s = 1.0 / math.sqrt(embed_dim)
    return {
        "wq": jax.random.uniform(kq, (embed_dim, embed_dim), jnp.float32, -s, s),
        "wk": jax.random.uniform(kk, (num_kv_heads * head_dim, embed_dim), jnp.float32, -s, s),
        "wv": jax.random.uniform(kv, (num_kv_heads * head_dim, embed_dim), jnp.float32, -s, s),
        "wo": jax.random.uniform(ko, (embed_dim, embed_dim), jnp.float32, -s, s),
    }


if __name__ == "__main__":
    # Small but TPU-lane-friendly config (consistent with LLM_Args):
    #   embed_dim=256, num_heads=2 -> head_dim=128 (lane-dense per-head tiles),
    #   num_kv_heads=1 -> GQA ratio r=2 exercised through the K/V index_map,
    #   S=256 with tq=tk=128 -> multiple KV tiles, causal tile-skip exercised.
    B, S = 2, 256
    embed_dim = 256
    num_heads = 2
    num_kv_heads = 1
    rope_base = 10000
    # attn_dropout = 0.0, kv_cache = None, mask = None, input_pos = None

    key = jax.random.PRNGKey(0)
    kp, kx = jax.random.split(key)
    params = init_params(kp, embed_dim, num_heads, num_kv_heads)
    x = jax.random.normal(kx, (B, S, embed_dim), jnp.float32)

    out = casual_self_attention2(
        x, params,
        num_heads=num_heads, num_kv_heads=num_kv_heads, rope_base=rope_base,
    )
    out = jax.block_until_ready(out)
    assert out.shape == (B, S, embed_dim)

    # Loose sanity check vs f32 reference (kernels use bf16 MXU inputs).
    ref = _ref_forward(
        x, params,
        num_heads=num_heads, num_kv_heads=num_kv_heads, rope_base=rope_base,
    )
    err = float(jnp.max(jnp.abs(out - ref)))
    assert err < 1e-1, f"max abs error vs reference too large: {err}"

    print("KERNEL_OK")
</pallas_src>

<mosaic_0001>
module attributes {stable_mosaic.version = 11 : i64} {
  func.func @_matmul_kernel(%arg0: i32, %arg1: i32, %arg2: i32, %arg3: memref<256x256xbf16, #tpu.memory_space<vmem>>, %arg4: memref<256x256xbf16, #tpu.memory_space<vmem>>, %arg5: memref<256x256xbf16, #tpu.memory_space<vmem>>, %arg6: memref<256x256xf32, #tpu.memory_space<vmem>>) attributes {dimension_semantics = [#tpu.dimension_semantics<parallel>, #tpu.dimension_semantics<parallel>, #tpu.dimension_semantics<arbitrary>], iteration_bounds = array<i64: 2, 1, 1>, scalar_prefetch = 0 : i64, scratch_operands = 1 : i64, tpu.core_type = #tpu.core_type<tc>, window_params = [{transform_indices = @transform_0, window_bounds = array<i64: 256, 256>}, {transform_indices = @transform_1, window_bounds = array<i64: 256, 256>}, {transform_indices = @transform_2, window_bounds = array<i64: 256, 256>}]} {
    %c0_i32 = arith.constant 0 : i32
    %0 = arith.cmpi eq, %arg2, %c0_i32 : i32
    %1 = arith.extui %0 : i1 to i32
    %c0_i32_0 = arith.constant 0 : i32
    %2 = arith.cmpi ne, %1, %c0_i32_0 : i32
    scf.if %2 {
      %cst_10 = arith.constant 0.000000e+00 : f32
      %12 = vector.broadcast %cst_10 : f32 to vector<256x256xf32>
      %c0_11 = arith.constant 0 : index
      %c0_12 = arith.constant 0 : index
      %13 = vector.load %arg6[%c0_11, %c0_12] : memref<256x256xf32, #tpu.memory_space<vmem>>, vector<256x256xf32>
      tpu.vector_store %arg6[%c0_11, %c0_12], %12 {strides = array<i32>} : memref<256x256xf32, #tpu.memory_space<vmem>>, vector<256x256xf32>,
    } else {
    }
    %c0 = arith.constant 0 : index
    %c0_1 = arith.constant 0 : index
    %3 = vector.load %arg6[%c0, %c0_1] : memref<256x256xf32, #tpu.memory_space<vmem>>, vector<256x256xf32>
    %c0_2 = arith.constant 0 : index
    %c0_3 = arith.constant 0 : index
    %4 = vector.load %arg3[%c0_2, %c0_3] : memref<256x256xbf16, #tpu.memory_space<vmem>>, vector<256x256xbf16>
    %c0_4 = arith.constant 0 : index
    %c0_5 = arith.constant 0 : index
    %5 = vector.load %arg4[%c0_4, %c0_5] : memref<256x256xbf16, #tpu.memory_space<vmem>>, vector<256x256xbf16>
    %cst = arith.constant dense<0.000000e+00> : vector<256x256xf32>
    %6 = tpu.matmul %4, %5, %cst {dimension_numbers = #tpu.dot_dimension_numbers<[1], [1], [0], [0], [0, 0, 1, 0], [], []>} : vector<256x256xbf16>, vector<256x256xbf16>, vector<256x256xf32> -> vector<256x256xf32>
    %7 = arith.addf %3, %6 : vector<256x256xf32>
    %c0_6 = arith.constant 0 : index
    %c0_7 = arith.constant 0 : index
    %8 = vector.load %arg6[%c0_6, %c0_7] : memref<256x256xf32, #tpu.memory_space<vmem>>, vector<256x256xf32>
    tpu.vector_store %arg6[%c0_6, %c0_7], %7 {strides = array<i32>} : memref<256x256xf32, #tpu.memory_space<vmem>>, vector<256x256xf32>,
    %c0_i32_8 = arith.constant 0 : i32
    %9 = arith.cmpi eq, %arg2, %c0_i32_8 : i32
    %10 = arith.extui %9 : i1 to i32
    %c0_i32_9 = arith.constant 0 : i32
    %11 = arith.cmpi ne, %10, %c0_i32_9 : i32
    scf.if %11 {
      %c0_10 = arith.constant 0 : index
      %c0_11 = arith.constant 0 : index
      %12 = vector.load %arg6[%c0_10, %c0_11] : memref<256x256xf32, #tpu.memory_space<vmem>>, vector<256x256xf32>
      %13 = arith.truncf %12 : vector<256x256xf32> to vector<256x256xbf16>
      %c0_12 = arith.constant 0 : index
      %c0_13 = arith.constant 0 : index
      %14 = vector.load %arg5[%c0_12, %c0_13] : memref<256x256xbf16, #tpu.memory_space<vmem>>, vector<256x256xbf16>
      tpu.vector_store %arg5[%c0_12, %c0_13], %13 {strides = array<i32>} : memref<256x256xbf16, #tpu.memory_space<vmem>>, vector<256x256xbf16>,
    } else {
    }
    return
  }
  func.func @transform_0(%arg0: i32, %arg1: i32, %arg2: i32) -> (i32, i32) {
    %c0_i32 = arith.constant 0 : i32
    return %arg0, %arg2 : i32, i32
  }
  func.func @transform_1(%arg0: i32, %arg1: i32, %arg2: i32) -> (i32, i32) {
    %c0_i32 = arith.constant 0 : i32
    return %arg1, %arg2 : i32, i32
  }
  func.func @transform_2(%arg0: i32, %arg1: i32, %arg2: i32) -> (i32, i32) {
    %c0_i32 = arith.constant 0 : i32
    return %arg0, %arg1 : i32, i32
  }
}

</mosaic_0001>

<bundles_post_ra>
// kernel: tpu_custom_call.1
= control target key start
LH: loop header
LB: loop body
LE: loop exit
PB: predicated region body
PF: predicated region fallthrough
CT: control target
= control target key end

     0   :  { %7 = vsyncpa [#allocation4], 0  ;;  %s2294_s0 = inlined_call_operand.hbm [shape: bf16[512,256], index: 0, kind: input, shape index: {}]   ;;  %s2295_s1 = inlined_call_operand.hbm [shape: bf16[256,256], index: 1, kind: input, shape index: {}]   ;;  %s2296_s2 = inlined_call_operand.hbm [shape: bf16[512,256], index: 2, kind: output, shape index: {}]  }
   0x1   :  { %9 = vsyncpa [#allocation4 + $0x1], 0 }
   0x2   :  { %10 = vsyncpa [#allocation7], 0 }
   0x3   :  { %11 = vsyncpa [#allocation5], 0 }
   0x4   :  { %13 = vsyncpa [#allocation5 + $0x1], 0  ;;  %s1996_s9 = smov 0   ;;  %s1998_s10 = smov 0  }
   0x5   :  { %s2000_s11 = smov 0   ;;  %s2002_s12 = smov 0  }
   0x6   :  { %s2004_s13 = smov 0   ;;  %s2006_s14 = smov 0  }
   0x7 LB: > { %s1472_s15 = sadd.s32 4294967295, %s1972_s14   ;;  %s1473_s16 = sadd.s32 4294967294, %s1972_s14   ;;  %s1972_s14 = sphi %s2006_s14, %s19_s14   ;;  %s1968_s13 = sphi %s2004_s13, %s2320_s13   ;;  %s1964_s12 = sphi %s2002_s12, %s2319_s12   ;;  %s1960_s11 = sphi %s2000_s11, %s2318_s11   ;;  %s1956_s10 = sphi %s1998_s10, %s2317_s10   ;;  %s1952_s9 = sphi %s1996_s9, %s2316_s9  }
   0x8   : > { %p60_p0 = scmp.ne.s32.totalorder %s1956_s10, %s1952_s9  ;;  %p2030_p1 = scmp.eq.s32.totalorder %s1472_s15, 0 }
   0x9   : > { %p2034_p2 = scmp.eq.s32.totalorder %s1472_s15, 1  ;;  %p120_p3 = scmp.eq.s32.totalorder %s1473_s16, 1 }
   0xa   : > { %s2301_s17 = scalar_select %p2030_p1, 1, 0 }
   0xb   : > { %s2302_s18 = scalar_select %p2034_p2, 1, 0 }
   0xc   : > { %p2040_p4 = por %p2030_p1, %p60_p0  ;;  %p1474_p5 = scmp.ge.s32.totalorder %s1972_s14, 1 }
   0xd   : > { %p2045_p6 = por %p120_p3, %p60_p0  ;;  %p127_p7 = scmp.lt.s32.totalorder %s1972_s14, 3 }
   0xe   : > { %s2303_s19 = scalar_select %p2040_p4, 1, 0 }
   0xf   : > { %s2304_s20 = scalar_select %p2045_p6, 1, 0 }
  0x10   : > { %p2050_p8 = pnand %p1474_p5, %p127_p7  ;;  %s1974_s22 = smov [#allocation6]  }
  0x11   : > { %s145_s23 = sshll.u32 %s1974_s22, 4  ;;  %s38_s25 = sadd.s32 1, %s1968_s13  ;;  %s146_s23 = int_to_ptr.vmem [resolvable:$true] %s145_s23 }
  0x12   : > { %s2305_s21 = scalar_select %p2050_p8, 1, 0 }
  0x13   : > { %p1663_p9 = pneg %p2050_p8  ;;  %s1828_s28 = scalar_lea.hbm %s2295_s1, 4096 }
  0x14   : > { %p1829_p12 = scmp.ne.s32.totalorder %s2295_s1, %s1828_s28  ;;  %p1835_p5 = scmp.lt.u32.totalorder %s1828_s28, %s2295_s1 }
  0x15   : > { %p2059_p11 = pnand %p1663_p9, %p2030_p1 }
  0x17   : > { %p1830_p13 = pneg %p2059_p11 }
  0x19   : > { %p1831_p0 = pnand %p1830_p13, %p1829_p12 }
  0x1b   : > { %p1832_p3 = pneg %p1831_p0 }
  0x1d   : > { %p1837_p7 = pnand %p1835_p5, %p1832_p3 }
  0x1f   : > { %1840 = shalt.err (!%p1837_p7)
}
  0x20   : > { %s1841_s5 = scalar_lea.vmem %s146_s23, 4096  ;;  %p1849_p1 = scmp.lt.s32.totalorder %s146_s23, %s146_s23 }
  0x21   : > { %p1842_p9 = scmp.ne.s32.totalorder %s146_s23, %s1841_s5  ;;  %p1850_p4 = scmp.lt.s32.totalorder %s1841_s5, %s1841_s5 }
  0x23   : > { %p1844_p10 = pnand %p1842_p9, %p1830_p13  ;;  %p1851_p8 = por %p1850_p4, %p1849_p1 }
  0x25   : > { %p1845_p6 = pneg %p1844_p10 }
  0x27   : > { %p1852_p2 = pnand %p1851_p8, %p1845_p6 }
  0x29   : > { %1855 = shalt.err (!%p1852_p2)
}
  0x2a   : > { %s1975_s6 = smov 128   ;;  %s1976_s7 = smov 8  }
  0x2b   : > { %1666 = dma.hbm_to_vmem [thread:$0]  (!%p2059_p11), %s2295_s1, 4096, %s146_s23, [#allocation7], %s1975_s6, %s1975_s6, %s1976_s7  }
  0x2c   : > { %p40_p1 = scmp.ge.s32.totalorder %s38_s25, 2  ;;  %s47_s16 = sadd.s32 1, %s1960_s11 }
  0x2d   : > { %p54_p2 = scmp.ne.s32.totalorder %s1960_s11, %s1956_s10  ;;  %p55_p4 = scmp.eq.s32.totalorder %s1972_s14, 0 }
  0x2e   : > { %s2322_s25 = smov (%p40_p1, %s38_s25), 0  ;;  %p2308_p8 = scmp.ne.s32.totalorder %s2302_s18, 0 }
  0x2f   : > { %p2089_p6 = por %p55_p4, %p54_p2  ;;  %s42_s26 = ssub.s32 %s1968_s13, %s2322_s25 }
  0x30   : > { %p2095_p10 = por %p2308_p8, %p54_p2  ;;  %p1676_p12 = scmp.lt.s32.totalorder %s1972_s14, 2 }
  0x31   : > { %p45_p11 = scmp.eq.s32.totalorder %s42_s26, 0  ;;  %s159_s23 = sand.u32 1, %s1960_s11  }
  0x32   : > { %s1477_s27 = sshll.u32 %s159_s23, 8  ;;  %s1588_s29 = sshll.u32 %s1968_s13, 12 }
  0x33   : > { %s2104_s28 = scalar_select %p45_p11, %s1960_s11, %s47_s16  }
  0x34   : > { %s2110_s4 = scalar_lea.hbm %s2294_s0, %s1588_s29  ;;  %s163_s18 = scalar_lea.vmem [#allocation3], %s1477_s27 }
  0x35   : > { %s173_s5 = sshll.u32 %s163_s18, 4  ;;  %p2116_p13 = pnand %p1676_p12, %p2089_p6  ;;  %s2112_s5 = int_to_ptr.vmem [resolvable:$true] %s173_s5 }
  0x36   : > { %s2120_s15 = scalar_lea.sflag [#allocation4], %s159_s23  ;;  %s1856_s16 = scalar_lea.hbm %s2110_s4, 4096 }
  0x37   : > { %p1857_p0 = scmp.ne.s32.totalorder %s2110_s4, %s1856_s16  ;;  %p1858_p3 = pneg %p2116_p13 }
  0x38   : > { %s1861_s22 = scalar_lea.hbm %s2294_s0, 8192  ;;  %p1862_p9 = scmp.lt.u32.totalorder %s2110_s4, %s2294_s0 }
  0x39   : > { %p1859_p5 = pnand %p1858_p3, %p1857_p0  ;;  %p1863_p1 = scmp.lt.u32.totalorder %s1861_s22, %s1856_s16 }
  0x3a   : > { %p1865_p4 = scmp.lt.u32.totalorder %s1856_s16, %s2110_s4 }
  0x3b   : > { %p1860_p7 = pneg %p1859_p5  ;;  %p1864_p2 = por %p1863_p1, %p1862_p9 }
  0x3d   : > { %p1866_p6 = por %p1865_p4, %p1864_p2 }
  0x3f   : > { %p1867_p8 = pnand %p1866_p6, %p1860_p7 }
  0x41   : > { %1870 = shalt.err (!%p1867_p8)
}
  0x42   : > { %s1871_s23 = scalar_lea.vmem %s2112_s5, 4096  ;;  %s1977_s3 = smov [#allocation3]  }
  0x43   : > { %p1872_p12 = scmp.ne.s32.totalorder %s2112_s5, %s1871_s23  ;;  %s1876_s18 = sshll.u32 %s1977_s3, 4  ;;  %s1877_s18 = int_to_ptr.vmem [resolvable:$false] %s1876_s18 }
  0x44   : > { %s1878_s26 = scalar_lea.vmem %s1877_s18, 8192  ;;  %p1879_p5 = scmp.lt.s32.totalorder %s2112_s5, %s1877_s18 }
  0x45   : > { %p1874_p11 = pnand %p1872_p12, %p1858_p3  ;;  %p1880_p9 = scmp.lt.s32.totalorder %s1878_s26, %s1871_s23 }
  0x47   : > { %p1875_p0 = pneg %p1874_p11  ;;  %p1881_p1 = por %p1880_p9, %p1879_p5 }
  0x49   : > { %p1882_p2 = pnand %p1881_p1, %p1875_p0 }
  0x4b   : > { %1885 = shalt.err (!%p1882_p2)
}
  0x4c   : > { %1670 = dma.hbm_to_vmem [thread:$0]  (!%p2116_p13), %s2110_s4, 4096, %s2112_s5, %s2120_s15, %s1975_s6, %s1975_s6, %s1976_s7  }
  0x4d   : > { %p2311_p3 = scmp.ne.s32.totalorder %s2305_s21, 0 }
  0x4e   : > { %s2154_s16 = sand.u32 (!%p2311_p3), 1, %s1956_s10   ;;  %p2312_p7 = scmp.ne.s32.totalorder (!%p2311_p3), %s2303_s19, 0 }
  0x4f   : > { %185 = sbr.rel (%p2311_p3) target bundleno = 507 (0x1fb), region = 28  ;;  %s1482_s27 = sshll.u32 (!%p2311_p3), %s2154_s16, 8 }
  0x50   : > { %s188_s22 = scalar_lea.sflag (!%p2311_p3), [#allocation4], %s2154_s16  ;;  %s2160_s8 = scalar_lea.vmem (!%p2311_p3), [#allocation3], %s1482_s27 }
  0x56   : > { %1939 = dma.done.wait (%p2312_p7), %s188_s22, 4096  }
  0x57   : > { %1941 = vsyncadd (%p2312_p7), %s188_s22, 4294963200  ;;  %p2313_p13 = scmp.ne.s32.totalorder %s2301_s17, 0 }
  0x59   : > { %1943 = dma.done.wait (%p2313_p13), [#allocation7], 4096  }
  0x5a   : > { %1945 = vsyncadd (%p2313_p13), [#allocation7], 4294963200  ;;  %v1732_v0 = vld [vmem:[#allocation6 + $0x4] ss:$8 sps:$4 sm:$0xff]   ;;  %v1734_v1 = vld [vmem:[#allocation6] ss:$8 sps:$4 sm:$0xff]  }
  0x5b   : > { %738 = vmatprep.subr.bf16.mxu0 %v1732_v0  ;;  %1623 = vmatprep.subr.bf16.mxu1 %v1732_v0  ;;  %v1735_v2 = vld [vmem:[#allocation6 + $0x14] ss:$8 sps:$4 sm:$0xff]   ;;  %v1737_v3 = vld [vmem:[#allocation6 + $0x10] ss:$8 sps:$4 sm:$0xff]   ;;  %v1738_v4 = vld [vmem:[#allocation6 + $0x24] ss:$8 sps:$4 sm:$0xff]  }
  0x5c   : > { %739 = vmatpush1.bf16.xpose.msra.mxu0 %v1734_v1  ;;  %1639 = vmatpush1.bf16.xpose.msra.mxu1 %v1734_v1  ;;  %v1740_v5 = vld [vmem:[#allocation6 + $0x20] ss:$8 sps:$4 sm:$0xff]   ;;  %v1741_v6 = vld [vmem:[#allocation6 + $0x34] ss:$8 sps:$4 sm:$0xff]   ;;  %v1782_v7 = vld [vmem:[%s2160_s8 + $0x4] ss:$8 sps:$4 sm:$0xff]  }
  0x5d   : > { %740 = vmatprep.subr.bf16.mxu0 %v1735_v2  ;;  %1624 = vmatprep.subr.bf16.mxu1 %v1735_v2  ;;  %v1743_v8 = vld [vmem:[#allocation6 + $0x30] ss:$8 sps:$4 sm:$0xff]   ;;  %v1785_v9 = vld [vmem:[%s2160_s8 + $0x84] ss:$8 sps:$4 sm:$0xff]   ;;  %v1746_v11 = vld [vmem:[#allocation6 + $0x40] ss:$8 sps:$4 sm:$0xff]  }
  0x5e   : > { %v1744_v10 = vld [vmem:[#allocation6 + $0x44] ss:$8 sps:$4 sm:$0xff]   ;;  %770 = vmatprep.mubr.bf16.mxu0 %v1782_v7  ;;  %850 = vmatprep.mubr.bf16.mxu1 %v1785_v9  ;;  %v1747_v12 = vld [vmem:[#allocation6 + $0x54] ss:$8 sps:$4 sm:$0xff]   ;;  %v1749_v13 = vld [vmem:[#allocation6 + $0x50] ss:$8 sps:$4 sm:$0xff]  }
  0x5f   : > { %v1750_v14 = vld [vmem:[#allocation6 + $0x64] ss:$8 sps:$4 sm:$0xff]   ;;  %v1752_v15 = vld [vmem:[#allocation6 + $0x60] ss:$8 sps:$4 sm:$0xff]   ;;  %v1753_v16 = vld [vmem:[#allocation6 + $0x74] ss:$8 sps:$4 sm:$0xff]  }
  0x60   : > { %v1755_v17 = vld [vmem:[#allocation6 + $0x70] ss:$8 sps:$4 sm:$0xff]   ;;  %v1756_v18 = vld [vmem:[#allocation6 + $0x84] ss:$8 sps:$4 sm:$0xff]   ;;  %v1758_v19 = vld [vmem:[#allocation6 + $0x80] ss:$8 sps:$4 sm:$0xff]  }
  0x61   : > { %v1759_v20 = vld [vmem:[#allocation6 + $0x94] ss:$8 sps:$4 sm:$0xff]   ;;  %v1761_v21 = vld [vmem:[#allocation6 + $0x90] ss:$8 sps:$4 sm:$0xff]   ;;  %v1762_v22 = vld [vmem:[#allocation6 + $0xa4] ss:$8 sps:$4 sm:$0xff]  }
  0x62   : > { %v1764_v23 = vld [vmem:[#allocation6 + $0xa0] ss:$8 sps:$4 sm:$0xff]   ;;  %v1765_v24 = vld [vmem:[#allocation6 + $0xb4] ss:$8 sps:$4 sm:$0xff]   ;;  %v1767_v25 = vld [vmem:[#allocation6 + $0xb0] ss:$8 sps:$4 sm:$0xff]  }
  0x63   : > { %v1768_v26 = vld [vmem:[#allocation6 + $0xc4] ss:$8 sps:$4 sm:$0xff]   ;;  %v1770_v27 = vld [vmem:[#allocation6 + $0xc0] ss:$8 sps:$4 sm:$0xff]   ;;  %v1771_v28 = vld [vmem:[#allocation6 + $0xd4] ss:$8 sps:$4 sm:$0xff]  }
  0x64   : > { %741 = vmatpush1.bf16.xpose.msra.mxu0 %v1737_v3  ;;  %1640 = vmatpush1.bf16.xpose.msra.mxu1 %v1737_v3  ;;  %v1773_v29 = vld [vmem:[#allocation6 + $0xd0] ss:$8 sps:$4 sm:$0xff]   ;;  %v1774_v30 = vld [vmem:[#allocation6 + $0xe4] ss:$8 sps:$4 sm:$0xff]   ;;  %v1776_v31 = vld [vmem:[#allocation6 + $0xe0] ss:$8 sps:$4 sm:$0xff]  }
  0x65   : > { %742 = vmatprep.subr.bf16.mxu0 %v1738_v4  ;;  %1625 = vmatprep.subr.bf16.mxu1 %v1738_v4  ;;  %v1777_v32 = vld [vmem:[#allocation6 + $0xf4] ss:$8 sps:$4 sm:$0xff]   ;;  %v1779_v33 = vld [vmem:[#allocation6 + $0xf0] ss:$8 sps:$4 sm:$0xff]   ;;  %v1780_v34 = vld [vmem:[%s2160_s8] ss:$8 sps:$4 sm:$0xff]  }
  0x66   : > { %v1783_v35 = vld [vmem:[%s2160_s8 + $0x80] ss:$8 sps:$4 sm:$0xff]   ;;  %v1786_v36 = vld [vmem:[%s2160_s8 + $0x14] ss:$8 sps:$4 sm:$0xff]   ;;  %v1790_v38 = vld [vmem:[%s2160_s8 + $0x10] ss:$8 sps:$4 sm:$0xff]  }
  0x67   : > { %v1788_v37 = vld [vmem:[%s2160_s8 + $0x94] ss:$8 sps:$4 sm:$0xff]   ;;  %v1791_v39 = vld [vmem:[%s2160_s8 + $0x90] ss:$8 sps:$4 sm:$0xff]   ;;  %v1792_v40 = vld [vmem:[%s2160_s8 + $0x24] ss:$8 sps:$4 sm:$0xff]  }
  0x68   : > { %v1794_v41 = vld [vmem:[%s2160_s8 + $0xa4] ss:$8 sps:$4 sm:$0xff]   ;;  %v1796_v42 = vld [vmem:[%s2160_s8 + $0x20] ss:$8 sps:$4 sm:$0xff]   ;;  %v1798_v44 = vld [vmem:[%s2160_s8 + $0x34] ss:$8 sps:$4 sm:$0xff]  }
  0x69   : > { %v1797_v43 = vld [vmem:[%s2160_s8 + $0xa0] ss:$8 sps:$4 sm:$0xff]   ;;  %v1800_v45 = vld [vmem:[%s2160_s8 + $0xb4] ss:$8 sps:$4 sm:$0xff]   ;;  %v1802_v46 = vld [vmem:[%s2160_s8 + $0x30] ss:$8 sps:$4 sm:$0xff]  }
  0x6a   : > { %v1803_v47 = vld [vmem:[%s2160_s8 + $0xb0] ss:$8 sps:$4 sm:$0xff]   ;;  %v1804_v48 = vld [vmem:[%s2160_s8 + $0x44] ss:$8 sps:$4 sm:$0xff]   ;;  %v1808_v50 = vld [vmem:[%s2160_s8 + $0x40] ss:$8 sps:$4 sm:$0xff]  }
  0x6b   : > { %v1806_v49 = vld [vmem:[%s2160_s8 + $0xc4] ss:$8 sps:$4 sm:$0xff]   ;;  %v1809_v51 = vld [vmem:[%s2160_s8 + $0xc0] ss:$8 sps:$4 sm:$0xff]   ;;  %v1810_v52 = vld [vmem:[%s2160_s8 + $0x54] ss:$8 sps:$4 sm:$0xff]  }
  0x6c   : > { %743 = vmatpush1.bf16.xpose.msra.mxu0 %v1740_v5  ;;  %1641 = vmatpush1.bf16.xpose.msra.mxu1 %v1740_v5  ;;  %v1812_v53 = vld [vmem:[%s2160_s8 + $0xd4] ss:$8 sps:$4 sm:$0xff]   ;;  %v1814_v54 = vld [vmem:[%s2160_s8 + $0x50] ss:$8 sps:$4 sm:$0xff]   ;;  %v1816_v56 = vld [vmem:[%s2160_s8 + $0x64] ss:$8 sps:$4 sm:$0xff]  }
  0x6d   : > { %744 = vmatprep.subr.bf16.mxu0 %v1741_v6  ;;  %1626 = vmatprep.subr.bf16.mxu1 %v1741_v6  ;;  %v1815_v55 = vld [vmem:[%s2160_s8 + $0xd0] ss:$8 sps:$4 sm:$0xff]   ;;  %v1818_v57 = vld [vmem:[%s2160_s8 + $0xe4] ss:$8 sps:$4 sm:$0xff]   ;;  %v1820_v58 = vld [vmem:[%s2160_s8 + $0x60] ss:$8 sps:$4 sm:$0xff]  }
  0x6e   : > { %v1821_v59 = vld [vmem:[%s2160_s8 + $0xe0] ss:$8 sps:$4 sm:$0xff]   ;;  %v1822_v60 = vld [vmem:[%s2160_s8 + $0x74] ss:$8 sps:$4 sm:$0xff]   ;;  %v1826_v62 = vld [vmem:[%s2160_s8 + $0x70] ss:$8 sps:$4 sm:$0xff]  }
  0x6f   : > { %v1824_v61 = vld [vmem:[%s2160_s8 + $0xf4] ss:$8 sps:$4 sm:$0xff]   ;;  %v1827_v63 = vld [vmem:[%s2160_s8 + $0xf0] ss:$8 sps:$4 sm:$0xff]   ;;  %s2204_s17 = scalar_lea.vmem [#allocation8], %s1482_s27  ;;  %s1622_s19 = sshll.u32 %s1964_s12, 12 }
  0x70   : > { %s1367_s21 = sshll.u32 %s2204_s17, 4  ;;  %s2239_s4 = scalar_lea.hbm %s2296_s2, %s1622_s19  ;;  %s2241_s21 = int_to_ptr.vmem [resolvable:$true] %s1367_s21 }
  0x71   : > { %s1351_s12 = scalar_lea.sflag [#allocation5], %s2154_s16  ;;  %s1886_s5 = scalar_lea.vmem %s2241_s21, 4096 }
  0x72   : > { %p1887_p4 = scmp.ne.s32.totalorder %s2241_s21, %s1886_s5  ;;  %s1978_s15 = smov [#allocation8]  }
  0x73   : > { %s1890_s29 = sshll.u32 %s1978_s15, 4  ;;  %s1891_s29 = int_to_ptr.vmem [resolvable:$false] %s1890_s29 }
  0x74   : > { %745 = vmatpush1.bf16.xpose.msra.mxu0 %v1743_v8  ;;  %1642 = vmatpush1.bf16.xpose.msra.mxu1 %v1743_v8  ;;  %p1888_p6 = pnand %p1887_p4, %p2095_p10  ;;  %s1892_s30 = scalar_lea.vmem %s1891_s29, 8192 }
  0x75   : > { %746 = vmatprep.subr.bf16.mxu0 %v1744_v10  ;;  %1627 = vmatprep.subr.bf16.mxu1 %v1744_v10  ;;  %p1893_p12 = scmp.lt.s32.totalorder %s2241_s21, %s1891_s29  ;;  %p1894_p11 = scmp.lt.s32.totalorder %s1892_s30, %s1886_s5 }
  0x76   : > { %p1889_p8 = pneg %p1888_p6 }
  0x77   : > { %p1895_p0 = por %p1894_p11, %p1893_p12 }
  0x79   : > { %p1896_p5 = pnand %p1895_p0, %p1889_p8 }
  0x7c   : > { %747 = vmatpush1.bf16.xpose.msra.mxu0 %v1746_v11  ;;  %1643 = vmatpush1.bf16.xpose.msra.mxu1 %v1746_v11 }
  0x7d   : > { %748 = vmatprep.subr.bf16.mxu0 %v1747_v12  ;;  %1628 = vmatprep.subr.bf16.mxu1 %v1747_v12 }
  0x84   : > { %749 = vmatpush1.bf16.xpose.msra.mxu0 %v1749_v13  ;;  %1644 = vmatpush1.bf16.xpose.msra.mxu1 %v1749_v13 }
  0x85   : > { %750 = vmatprep.subr.bf16.mxu0 %v1750_v14  ;;  %1629 = vmatprep.subr.bf16.mxu1 %v1750_v14 }
  0x8c   : > { %751 = vmatpush1.bf16.xpose.msra.mxu0 %v1752_v15  ;;  %1645 = vmatpush1.bf16.xpose.msra.mxu1 %v1752_v15 }
  0x8d   : > { %752 = vmatprep.subr.bf16.mxu0 %v1753_v16  ;;  %1630 = vmatprep.subr.bf16.mxu1 %v1753_v16 }
  0x94   : > { %753 = vmatpush1.bf16.xpose.msra.mxu0 %v1755_v17  ;;  %1646 = vmatpush1.bf16.xpose.msra.mxu1 %v1755_v17 }
  0x95   : > { %754 = vmatprep.subr.bf16.mxu0 %v1756_v18  ;;  %1631 = vmatprep.subr.bf16.mxu1 %v1756_v18 }
  0x9c   : > { %755 = vmatpush1.bf16.xpose.msra.mxu0 %v1758_v19  ;;  %1647 = vmatpush1.bf16.xpose.msra.mxu1 %v1758_v19 }
  0x9d   : > { %756 = vmatprep.subr.bf16.mxu0 %v1759_v20  ;;  %1632 = vmatprep.subr.bf16.mxu1 %v1759_v20 }
  0xa4   : > { %757 = vmatpush1.bf16.xpose.msra.mxu0 %v1761_v21  ;;  %1648 = vmatpush1.bf16.xpose.msra.mxu1 %v1761_v21 }
  0xa5   : > { %758 = vmatprep.subr.bf16.mxu0 %v1762_v22  ;;  %1633 = vmatprep.subr.bf16.mxu1 %v1762_v22 }
  0xac   : > { %759 = vmatpush1.bf16.xpose.msra.mxu0 %v1764_v23  ;;  %1649 = vmatpush1.bf16.xpose.msra.mxu1 %v1764_v23 }
  0xad   : > { %760 = vmatprep.subr.bf16.mxu0 %v1765_v24  ;;  %1634 = vmatprep.subr.bf16.mxu1 %v1765_v24 }
  0xb4   : > { %761 = vmatpush1.bf16.xpose.msra.mxu0 %v1767_v25  ;;  %1650 = vmatpush1.bf16.xpose.msra.mxu1 %v1767_v25 }
  0xb5   : > { %762 = vmatprep.subr.bf16.mxu0 %v1768_v26  ;;  %1635 = vmatprep.subr.bf16.mxu1 %v1768_v26 }
  0xbc   : > { %763 = vmatpush1.bf16.xpose.msra.mxu0 %v1770_v27  ;;  %1651 = vmatpush1.bf16.xpose.msra.mxu1 %v1770_v27 }
  0xbd   : > { %764 = vmatprep.subr.bf16.mxu0 %v1771_v28  ;;  %1636 = vmatprep.subr.bf16.mxu1 %v1771_v28 }
  0xc4   : > { %765 = vmatpush1.bf16.xpose.msra.mxu0 %v1773_v29  ;;  %1652 = vmatpush1.bf16.xpose.msra.mxu1 %v1773_v29 }
  0xc5   : > { %766 = vmatprep.subr.bf16.mxu0 %v1774_v30  ;;  %1637 = vmatprep.subr.bf16.mxu1 %v1774_v30 }
  0xcc   : > { %767 = vmatpush1.bf16.xpose.msra.mxu0 %v1776_v31  ;;  %1653 = vmatpush1.bf16.xpose.msra.mxu1 %v1776_v31 }
  0xcd   : > { %768 = vmatprep.subr.bf16.mxu0 %v1777_v32  ;;  %1638 = vmatprep.subr.bf16.mxu1 %v1777_v32 }
  0xd4   : > { %769 = vmatpush1.bf16.xpose.msra.mxu0 %v1779_v33  ;;  %1654 = vmatpush1.bf16.xpose.msra.mxu1 %v1779_v33 }
  0xdb   : > { %771 = vmatmul.mubr.bf16.vlgmr.msra.gmra.mrb[0].mxu0 %v1780_v34  ;;  %851 = vmatmul.mubr.bf16.vlgmr.msra.gmra.mrb[0].mxu1 %v1783_v35 }
  0xdc   : > { %780 = vmatprep.mubr.bf16.mxu0 %v1786_v36  ;;  %860 = vmatprep.mubr.bf16.mxu1 %v1788_v37 }
  0xe3   : > { %781 = vmatmul.mubr.bf16.gmra.mrb[4].mxu0 %v1790_v38  ;;  %861 = vmatmul.mubr.bf16.gmra.mrb[4].mxu1 %v1791_v39 }
  0xe4   : > { %790 = vmatprep.mubr.bf16.mxu0 %v1792_v40  ;;  %870 = vmatprep.mubr.bf16.mxu1 %v1794_v41 }
  0xeb   : > { %791 = vmatmul.mubr.bf16.gmra.mrb[8].mxu0 %v1796_v42  ;;  %871 = vmatmul.mubr.bf16.gmra.mrb[8].mxu1 %v1797_v43 }
  0xec   : > { %800 = vmatprep.mubr.bf16.mxu0 %v1798_v44  ;;  %880 = vmatprep.mubr.bf16.mxu1 %v1800_v45 }
  0xf3   : > { %801 = vmatmul.mubr.bf16.gmra.mrb[12].mxu0 %v1802_v46  ;;  %881 = vmatmul.mubr.bf16.gmra.mrb[12].mxu1 %v1803_v47 }
  0xf4   : > { %810 = vmatprep.mubr.bf16.mxu0 %v1804_v48  ;;  %890 = vmatprep.mubr.bf16.mxu1 %v1806_v49 }
  0xfb   : > { %811 = vmatmul.mubr.bf16.gmra.mrb[16].mxu0 %v1808_v50  ;;  %891 = vmatmul.mubr.bf16.gmra.mrb[16].mxu1 %v1809_v51 }
  0xfc   : > { %820 = vmatprep.mubr.bf16.mxu0 %v1810_v52  ;;  %900 = vmatprep.mubr.bf16.mxu1 %v1812_v53 }
 0x103   : > { %821 = vmatmul.mubr.bf16.gmra.mrb[20].mxu0 %v1814_v54  ;;  %901 = vmatmul.mubr.bf16.gmra.mrb[20].mxu1 %v1815_v55 }
 0x104   : > { %830 = vmatprep.mubr.bf16.mxu0 %v1816_v56  ;;  %910 = vmatprep.mubr.bf16.mxu1 %v1818_v57 }
 0x10b   : > { %831 = vmatmul.mubr.bf16.gmra.mrb[24].mxu0 %v1820_v58  ;;  %911 = vmatmul.mubr.bf16.gmra.mrb[24].mxu1 %v1821_v59 }
 0x10c   : > { %840 = vmatprep.mubr.bf16.mxu0 %v1822_v60  ;;  %920 = vmatprep.mubr.bf16.mxu1 %v1824_v61 }
 0x113   : > { %841 = vmatmul.mubr.bf16.gmra.mrb[28].mxu0 %v1826_v62  ;;  %921 = vmatmul.mubr.bf16.gmra.mrb[28].mxu1 %v1827_v63 }
 0x1ae   : > { %v772_v0 = vpop.f32.mrb[0].mxu0  ;;  %v852_v1 = vpop.f32.mrb[0].mxu1 }
 0x1af   : > { %v774_v2 = vpop.f32.mrb[1].mxu0  ;;  %v854_v3 = vpop.f32.mrb[1].mxu1 }
 0x1b0   : > { %v1589_v4 = vpack.c.bf16 %v774_v2, %v772_v0  ;;  %v1605_v5 = vpack.c.bf16 %v854_v3, %v852_v1  ;;  %v776_v6 = vpop.f32.mrb[2].mxu0  ;;  %v856_v7 = vpop.f32.mrb[2].mxu1 }
 0x1b1   : > { %v778_v8 = vpop.f32.mrb[3].mxu0  ;;  %v858_v9 = vpop.f32.mrb[3].mxu1 }
 0x1b2   : > { %1318 = vst [vmem:[%s2204_s17] sm:$0xff] %v1589_v4  ;;  %1334 = vst [vmem:[%s2204_s17 + $0x80] sm:$0xff] %v1605_v5  ;;  %v1590_v10 = vpack.c.bf16 %v778_v8, %v776_v6  ;;  %v1606_v11 = vpack.c.bf16 %v858_v9, %v856_v7 }
 0x1b4   : > { %1319 = vst [vmem:[%s2204_s17 + $0x8] sm:$0xff] %v1590_v10  ;;  %1335 = vst [vmem:[%s2204_s17 + $0x88] sm:$0xff] %v1606_v11 }
 0x1b6   : > { %v782_v12 = vpop.f32.mrb[4].mxu0  ;;  %v862_v13 = vpop.f32.mrb[4].mxu1 }
 0x1b7   : > { %v784_v14 = vpop.f32.mrb[5].mxu0  ;;  %v864_v15 = vpop.f32.mrb[5].mxu1 }
 0x1b8   : > { %v1591_v16 = vpack.c.bf16 %v784_v14, %v782_v12  ;;  %v1607_v17 = vpack.c.bf16 %v864_v15, %v862_v13  ;;  %v786_v18 = vpop.f32.mrb[6].mxu0  ;;  %v866_v19 = vpop.f32.mrb[6].mxu1 }
 0x1b9   : > { %v788_v20 = vpop.f32.mrb[7].mxu0  ;;  %v868_v21 = vpop.f32.mrb[7].mxu1 }
 0x1ba   : > { %1320 = vst [vmem:[%s2204_s17 + $0x10] sm:$0xff] %v1591_v16  ;;  %1336 = vst [vmem:[%s2204_s17 + $0x90] sm:$0xff] %v1607_v17  ;;  %v1592_v22 = vpack.c.bf16 %v788_v20, %v786_v18  ;;  %v1608_v23 = vpack.c.bf16 %v868_v21, %v866_v19 }
 0x1bc   : > { %1321 = vst [vmem:[%s2204_s17 + $0x18] sm:$0xff] %v1592_v22  ;;  %1337 = vst [vmem:[%s2204_s17 + $0x98] sm:$0xff] %v1608_v23 }
 0x1be   : > { %v792_v24 = vpop.f32.mrb[8].mxu0  ;;  %v872_v25 = vpop.f32.mrb[8].mxu1 }
 0x1bf   : > { %v794_v26 = vpop.f32.mrb[9].mxu0  ;;  %v874_v27 = vpop.f32.mrb[9].mxu1 }
 0x1c0   : > { %v1593_v28 = vpack.c.bf16 %v794_v26, %v792_v24  ;;  %v1609_v29 = vpack.c.bf16 %v874_v27, %v872_v25  ;;  %v796_v30 = vpop.f32.mrb[10].mxu0  ;;  %v876_v31 = vpop.f32.mrb[10].mxu1 }
 0x1c1   : > { %v798_v32 = vpop.f32.mrb[11].mxu0  ;;  %v878_v33 = vpop.f32.mrb[11].mxu1 }
 0x1c2   : > { %1322 = vst [vmem:[%s2204_s17 + $0x20] sm:$0xff] %v1593_v28  ;;  %1338 = vst [vmem:[%s2204_s17 + $0xa0] sm:$0xff] %v1609_v29  ;;  %v1594_v34 = vpack.c.bf16 %v798_v32, %v796_v30  ;;  %v1610_v35 = vpack.c.bf16 %v878_v33, %v876_v31 }
 0x1c4   : > { %1323 = vst [vmem:[%s2204_s17 + $0x28] sm:$0xff] %v1594_v34  ;;  %1339 = vst [vmem:[%s2204_s17 + $0xa8] sm:$0xff] %v1610_v35 }
 0x1c6   : > { %v802_v36 = vpop.f32.mrb[12].mxu0  ;;  %v882_v37 = vpop.f32.mrb[12].mxu1 }
 0x1c7   : > { %v804_v38 = vpop.f32.mrb[13].mxu0  ;;  %v884_v39 = vpop.f32.mrb[13].mxu1 }
 0x1c8   : > { %v1595_v40 = vpack.c.bf16 %v804_v38, %v802_v36  ;;  %v1611_v41 = vpack.c.bf16 %v884_v39, %v882_v37  ;;  %v806_v42 = vpop.f32.mrb[14].mxu0  ;;  %v886_v43 = vpop.f32.mrb[14].mxu1 }
 0x1c9   : > { %v808_v44 = vpop.f32.mrb[15].mxu0  ;;  %v888_v45 = vpop.f32.mrb[15].mxu1 }
 0x1ca   : > { %1324 = vst [vmem:[%s2204_s17 + $0x30] sm:$0xff] %v1595_v40  ;;  %1340 = vst [vmem:[%s2204_s17 + $0xb0] sm:$0xff] %v1611_v41  ;;  %v1596_v46 = vpack.c.bf16 %v808_v44, %v806_v42  ;;  %v1612_v47 = vpack.c.bf16 %v888_v45, %v886_v43 }
 0x1cc   : > { %1325 = vst [vmem:[%s2204_s17 + $0x38] sm:$0xff] %v1596_v46  ;;  %1341 = vst [vmem:[%s2204_s17 + $0xb8] sm:$0xff] %v1612_v47 }
 0x1ce   : > { %v812_v48 = vpop.f32.mrb[16].mxu0  ;;  %v892_v49 = vpop.f32.mrb[16].mxu1 }
 0x1cf   : > { %v814_v50 = vpop.f32.mrb[17].mxu0  ;;  %v894_v51 = vpop.f32.mrb[17].mxu1 }
 0x1d0   : > { %v1597_v52 = vpack.c.bf16 %v814_v50, %v812_v48  ;;  %v1613_v53 = vpack.c.bf16 %v894_v51, %v892_v49  ;;  %v816_v54 = vpop.f32.mrb[18].mxu0  ;;  %v896_v55 = vpop.f32.mrb[18].mxu1 }
 0x1d1   : > { %v818_v56 = vpop.f32.mrb[19].mxu0  ;;  %v898_v57 = vpop.f32.mrb[19].mxu1 }
 0x1d2   : > { %1326 = vst [vmem:[%s2204_s17 + $0x40] sm:$0xff] %v1597_v52  ;;  %1342 = vst [vmem:[%s2204_s17 + $0xc0] sm:$0xff] %v1613_v53  ;;  %v1598_v58 = vpack.c.bf16 %v818_v56, %v816_v54  ;;  %v1614_v59 = vpack.c.bf16 %v898_v57, %v896_v55 }
 0x1d4   : > { %1327 = vst [vmem:[%s2204_s17 + $0x48] sm:$0xff] %v1598_v58  ;;  %1343 = vst [vmem:[%s2204_s17 + $0xc8] sm:$0xff] %v1614_v59 }
 0x1d6   : > { %v822_v60 = vpop.f32.mrb[20].mxu0  ;;  %v902_v61 = vpop.f32.mrb[20].mxu1 }
 0x1d7   : > { %v824_v62 = vpop.f32.mrb[21].mxu0  ;;  %v904_v63 = vpop.f32.mrb[21].mxu1 }
 0x1d8   : > { %v1599_v0 = vpack.c.bf16 %v824_v62, %v822_v60  ;;  %v1615_v1 = vpack.c.bf16 %v904_v63, %v902_v61  ;;  %v826_v2 = vpop.f32.mrb[22].mxu0  ;;  %v906_v3 = vpop.f32.mrb[22].mxu1 }
 0x1d9   : > { %v828_v4 = vpop.f32.mrb[23].mxu0  ;;  %v908_v5 = vpop.f32.mrb[23].mxu1 }
 0x1da   : > { %1328 = vst [vmem:[%s2204_s17 + $0x50] sm:$0xff] %v1599_v0  ;;  %1344 = vst [vmem:[%s2204_s17 + $0xd0] sm:$0xff] %v1615_v1  ;;  %v1600_v6 = vpack.c.bf16 %v828_v4, %v826_v2  ;;  %v1616_v7 = vpack.c.bf16 %v908_v5, %v906_v3 }
 0x1dc   : > { %1329 = vst [vmem:[%s2204_s17 + $0x58] sm:$0xff] %v1600_v6  ;;  %1345 = vst [vmem:[%s2204_s17 + $0xd8] sm:$0xff] %v1616_v7 }
 0x1de   : > { %v832_v8 = vpop.f32.mrb[24].mxu0  ;;  %v912_v9 = vpop.f32.mrb[24].mxu1 }
 0x1df   : > { %v834_v10 = vpop.f32.mrb[25].mxu0  ;;  %v914_v11 = vpop.f32.mrb[25].mxu1 }
 0x1e0   : > { %v1601_v12 = vpack.c.bf16 %v834_v10, %v832_v8  ;;  %v1617_v13 = vpack.c.bf16 %v914_v11, %v912_v9  ;;  %v836_v14 = vpop.f32.mrb[26].mxu0  ;;  %v916_v15 = vpop.f32.mrb[26].mxu1 }
 0x1e1   : > { %v838_v16 = vpop.f32.mrb[27].mxu0  ;;  %v918_v17 = vpop.f32.mrb[27].mxu1 }
 0x1e2   : > { %1330 = vst [vmem:[%s2204_s17 + $0x60] sm:$0xff] %v1601_v12  ;;  %1346 = vst [vmem:[%s2204_s17 + $0xe0] sm:$0xff] %v1617_v13  ;;  %v1602_v18 = vpack.c.bf16 %v838_v16, %v836_v14  ;;  %v1618_v19 = vpack.c.bf16 %v918_v17, %v916_v15 }
 0x1e4   : > { %1331 = vst [vmem:[%s2204_s17 + $0x68] sm:$0xff] %v1602_v18  ;;  %1347 = vst [vmem:[%s2204_s17 + $0xe8] sm:$0xff] %v1618_v19 }
 0x1e6   : > { %v842_v20 = vpop.f32.mrb[28].mxu0  ;;  %v922_v21 = vpop.f32.mrb[28].mxu1 }
 0x1e7   : > { %v844_v22 = vpop.f32.mrb[29].mxu0  ;;  %v924_v23 = vpop.f32.mrb[29].mxu1 }
 0x1e8   : > { %v1603_v24 = vpack.c.bf16 %v844_v22, %v842_v20  ;;  %v1619_v25 = vpack.c.bf16 %v924_v23, %v922_v21  ;;  %v846_v26 = vpop.f32.mrb[30].mxu0  ;;  %v926_v27 = vpop.f32.mrb[30].mxu1 }
 0x1e9   : > { %v848_v28 = vpop.f32.mrb[31].mxu0  ;;  %v928_v29 = vpop.f32.mrb[31].mxu1 }
 0x1ea   : > { %1332 = vst [vmem:[%s2204_s17 + $0x70] sm:$0xff] %v1603_v24  ;;  %1348 = vst [vmem:[%s2204_s17 + $0xf0] sm:$0xff] %v1619_v25  ;;  %v1604_v30 = vpack.c.bf16 %v848_v28, %v846_v26  ;;  %v1620_v31 = vpack.c.bf16 %v928_v29, %v926_v27 }
 0x1ec   : > { %1333 = vst [vmem:[%s2204_s17 + $0x78] sm:$0xff] %v1604_v30  ;;  %1349 = vst [vmem:[%s2204_s17 + $0xf8] sm:$0xff] %v1620_v31 }
 0x1ed   : > { %1899 = shalt.err (!%p1896_p5)
}
 0x1ee   : > { %s1900_s23 = scalar_lea.hbm %s2239_s4, 4096  ;;  %s1904_s26 = scalar_lea.hbm %s2296_s2, 8192 }
 0x1ef   : > { %p1901_p9 = scmp.ne.s32.totalorder %s2239_s4, %s1900_s23  ;;  %p1905_p3 = scmp.lt.u32.totalorder %s2239_s4, %s2296_s2 }
 0x1f0   : > { %p1906_p7 = scmp.lt.u32.totalorder %s1904_s26, %s1900_s23  ;;  %p1908_p4 = scmp.lt.u32.totalorder %s1900_s23, %s2239_s4 }
 0x1f1   : > { %p1902_p1 = pnand %p1901_p9, %p2095_p10 }
 0x1f2   : > { %p1907_p13 = por %p1906_p7, %p1905_p3 }
 0x1f3   : > { %p1903_p2 = pneg %p1902_p1 }
 0x1f4   : > { %p1909_p6 = por %p1908_p4, %p1907_p13 }
 0x1f6   : > { %p1910_p8 = pnand %p1909_p6, %p1903_p2 }
 0x1f8   : > { %1913 = shalt.err (!%p1910_p8)
}
 0x1f9   : > { %s1979_s8 = smov 128   ;;  %s1980_s17 = smov 8  }
 0x1fa   : > { %1661 = dma.vmem_to_hbm [thread:$0]  (%p2095_p10), %s2241_s21, 4096, %s2239_s4, %s1351_s12, %s1979_s8, %s1979_s8, %s1980_s17  }
 0x1fb PF: > { %s1382_s19 = sand.u32 1, %s1952_s9   ;;  %p2314_p12 = scmp.ne.s32.totalorder %s2304_s20, 0 }
 0x1fc   : > { %p2315_p11 = scmp.ge.s32.totalorder %s1972_s14, 2  ;;  %s1383_s6 = scalar_lea.sflag [#allocation5], %s1382_s19 }
 0x1fe   : > { %p1672_p0 = pnand %p2315_p11, %p2314_p12 }
 0x200   : > { %1947 = dma.done.wait (!%p1672_p0), %s1383_s6, 4096  }
 0x201   : > { %1949 = vsyncadd (!%p1672_p0), %s1383_s6, 4294963200  ;;  %s19_s14 = sadd.s32 1, %s1972_s14   ;;  %s2316_s9 = smov %s1956_s10 }
 0x202   : > { %p16_p5 = scmp.ge.s32.totalorder %s19_s14, 4   ;;  %s2317_s10 = smov %s1960_s11 }
 0x203   : > { %s2318_s11 = smov %s2104_s28  ;;  %s2319_s12 = smov %s1968_s13 }
 0x204   : > { %s2320_s13 = smov %s2322_s25  ;;  %18 = sbr.rel (!%p16_p5) target bundleno = 7 (0x7), region = 86 }
 0x20b   :  { %1388 = vsyncpa [#allocation4], 1 }
 0x20c   :  { %1390 = vsyncpa [#allocation4 + $0x1], 1 }
 0x20d   :  { %1391 = vsyncpa [#allocation7], 1 }
 0x20e   :  { %1392 = vsyncpa [#allocation5], 1 }
 0x20f   :  { %1394 = vsyncpa [#allocation5 + $0x1], 1 }

</bundles_post_ra>
